<compile_context>
chip_gen: v7x
topology: tpu7x:2x2x1
jax: 0.10.0
libtpu: 0.0.40
codegen_flags: <defaults>
</compile_context>

<pallas_src>
import functools

import jax
import jax.numpy as jnp
from jax.experimental import pallas as pl
from jax.experimental.pallas import tpu as pltpu


def _round_up(n, m):
    return ((n + m - 1) // m) * m


def pack_params(w1, b1, w2, b2):
    """Pack PyTorch-orientation params into (bf16 weight slab, f32 bias slab).

    w1: [hidden, state]  b1: [hidden]   (fc1)
    w2: [action, hidden] b2: [action]   (fc2)

    Weight slab (bf16, lanes padded to 128):
      rows [0 : hidden)                cols [0 : state)   -> w1
      rows [r1 : r1 + action)          cols [0 : hidden)  -> w2   (r1 = round_up(hidden, 16))
    Bias slab (f32, [round_up(max(hidden, action), 8), 128]):
      col 0 rows [0 : hidden) -> b1 ; col 1 rows [0 : action) -> b2
    """
    hidden_dim, state_dim = w1.shape
    action_dim, _ = w2.shape
    lanes = _round_up(max(state_dim, hidden_dim), 128)
    r1 = _round_up(hidden_dim, 16)
    r2 = _round_up(action_dim, 16)

    w_slab = jnp.zeros((r1 + r2, lanes), jnp.bfloat16)
    w_slab = w_slab.at[0:hidden_dim, 0:state_dim].set(w1.astype(jnp.bfloat16))
    w_slab = w_slab.at[r1:r1 + action_dim, 0:hidden_dim].set(w2.astype(jnp.bfloat16))

    b_rows = _round_up(max(hidden_dim, action_dim), 8)
    b_slab = jnp.zeros((b_rows, 128), jnp.float32)
    b_slab = b_slab.at[0:hidden_dim, 0].set(jnp.reshape(b1, (-1,)))
    b_slab = b_slab.at[0:action_dim, 1].set(jnp.reshape(b2, (-1,)))
    return w_slab, b_slab


def _policy_net_kernel(x_ref, w_ref, b_ref, out_ref, *, state_dim, hidden_dim,
                       action_dim):
    """Transposed forward: x_ref [state, tb] -> out_ref [action, tb]."""
    r1 = _round_up(hidden_dim, 16)
    w1 = w_ref[0:hidden_dim, 0:state_dim]          # bf16 [hidden, state]
    w2 = w_ref[r1:r1 + action_dim, 0:hidden_dim]   # bf16 [action, hidden]
    b1 = b_ref[0:hidden_dim, 0:1]                  # f32  [hidden, 1]
    b2 = b_ref[0:action_dim, 1:2]                  # f32  [action, 1]

    x_t = x_ref[...].astype(jnp.bfloat16)          # [state, tb]

    # fc1 + ReLU: bf16 MXU operands, f32 accumulate; elementwise stays f32.
    h = jnp.dot(w1, x_t, preferred_element_type=jnp.float32) + b1
    h = jnp.maximum(h, 0.0)                        # f32 [hidden, tb]

    # fc2 logits.
    logits = jnp.dot(w2, h.astype(jnp.bfloat16),
                     preferred_element_type=jnp.float32) + b2  # [action, tb]

    # Numerically-stable softmax over the action axis (PyTorch dim=1), which
    # is the sublane axis here -> lane-dense exp/max/sum.  Exact divide so
    # probabilities sum to 1 to f32 precision.
    m = jnp.max(logits, axis=0, keepdims=True)
    e = jnp.exp(logits - m)
    denom = jnp.sum(e, axis=0, keepdims=True)
    out_ref[...] = (e / denom).astype(out_ref.dtype)


def policy_net_forward(x, w_slab, b_slab, state_dim, hidden_dim, action_dim, *,
                       block_batch=8192, vmem_limit_bytes=32 * 1024 * 1024):
    """x: [B, state_dim] f32 -> probs: [B, action_dim] f32."""
    B = x.shape[0]
    x_t = jnp.transpose(x)  # [state_dim, B] — one cheap XLA transpose.
    kernel = functools.partial(
        _policy_net_kernel, state_dim=state_dim, hidden_dim=hidden_dim,
        action_dim=action_dim)

    if B <= block_batch:
        # Single-tile problem: grid-less call, everything resident in VMEM.
        out_t = pl.pallas_call(
            kernel,
            out_shape=jax.ShapeDtypeStruct((action_dim, B), jnp.float32),
            in_specs=[
                pl.BlockSpec(memory_space=pltpu.MemorySpace.VMEM),
                pl.BlockSpec(memory_space=pltpu.MemorySpace.VMEM),
                pl.BlockSpec(memory_space=pltpu.MemorySpace.VMEM),
            ],
            out_specs=pl.BlockSpec(memory_space=pltpu.MemorySpace.VMEM),
        )(x_t, w_slab, b_slab)
        return jnp.transpose(out_t)

    # Large batches: tile the (lane) batch axis with big, 256-aligned tiles so
    # per-step DMA traffic dominates the ~0.35us grid-step overhead.  Weight
    # and bias slabs have constant index_maps -> stay VMEM-resident.
    tb = max(256, (min(block_batch, B) // 256) * 256)
    B_pad = _round_up(B, tb)
    if B_pad != B:
        x_t = jnp.pad(x_t, ((0, 0), (0, B_pad - B)))  # full, unmasked tiles
    grid = (B_pad // tb,)

    out_t = pl.pallas_call(
        kernel,
        out_shape=jax.ShapeDtypeStruct((action_dim, B_pad), jnp.float32),
        grid=grid,
        in_specs=[
            pl.BlockSpec((state_dim, tb), lambda i: (0, i)),
            pl.BlockSpec(w_slab.shape, lambda i: (0, 0)),
            pl.BlockSpec(b_slab.shape, lambda i: (0, 0)),
        ],
        out_specs=pl.BlockSpec((action_dim, tb), lambda i: (0, i)),
        compiler_params=pltpu.CompilerParams(
            dimension_semantics=("parallel",),
            vmem_limit_bytes=vmem_limit_bytes),
    )(x_t, w_slab, b_slab)
    return jnp.transpose(out_t[:, :B])


def init_params(key, state_dim, hidden_dim, action_dim):
    """torch.nn.Linear-style init: U[-1/sqrt(fan_in), +1/sqrt(fan_in)]."""
    k1, k2, k3, k4 = jax.random.split(key, 4)
    bound1 = 1.0 / (state_dim ** 0.5)
    bound2 = 1.0 / (hidden_dim ** 0.5)
    w1 = jax.random.uniform(k1, (hidden_dim, state_dim), jnp.float32, -bound1, bound1)
    b1 = jax.random.uniform(k2, (hidden_dim,), jnp.float32, -bound1, bound1)
    w2 = jax.random.uniform(k3, (action_dim, hidden_dim), jnp.float32, -bound2, bound2)
    b2 = jax.random.uniform(k4, (action_dim,), jnp.float32, -bound2, bound2)
    return w1, b1, w2, b2


def reference_forward(x, w1, b1, w2, b2, matmul_dtype=jnp.bfloat16):
    """Plain-JAX reference mirroring the PyTorch forward."""
    h = jnp.dot(x.astype(matmul_dtype), w1.T.astype(matmul_dtype),
                preferred_element_type=jnp.float32) + b1
    h = jnp.maximum(h, 0.0)
    logits = jnp.dot(h.astype(matmul_dtype), w2.T.astype(matmul_dtype),
                     preferred_element_type=jnp.float32) + b2
    return jax.nn.softmax(logits, axis=1)


if __name__ == "__main__":
    state_dim, hidden_dim, action_dim = 8, 32, 4

    key = jax.random.PRNGKey(0)
    kp, kx1, kx2 = jax.random.split(key, 3)
    w1, b1, w2, b2 = init_params(kp, state_dim, hidden_dim, action_dim)
    w_slab, b_slab = pack_params(w1, b1, w2, b2)

    # 1) Small batch -> grid-less single-tile path.
    x_small = jax.random.normal(kx1, (8, state_dim), jnp.float32)
    out_small = jax.block_until_ready(
        policy_net_forward(x_small, w_slab, b_slab, state_dim, hidden_dim, action_dim))
    ref_small = reference_forward(x_small, w1, b1, w2, b2, matmul_dtype=jnp.bfloat16)
    ref_small_f32 = reference_forward(x_small, w1, b1, w2, b2, matmul_dtype=jnp.float32)
    assert out_small.shape == (8, action_dim)
    assert jnp.allclose(out_small, ref_small, atol=2e-3, rtol=2e-3)
    assert jnp.allclose(out_small, ref_small_f32, atol=3e-2)
    assert jnp.allclose(jnp.sum(out_small, axis=1), 1.0, atol=1e-4)  # exact-divide softmax

    # 2) Larger, non-tile-aligned batch -> padded, batch-tiled grid path.
    x_big = jax.random.normal(kx2, (600, state_dim), jnp.float32)
    out_big = jax.block_until_ready(
        policy_net_forward(x_big, w_slab, b_slab, state_dim, hidden_dim, action_dim,
                           block_batch=256))  # small block to exercise grid=(3,)
    ref_big = reference_forward(x_big, w1, b1, w2, b2, matmul_dtype=jnp.bfloat16)
    assert out_big.shape == (600, action_dim)
    assert jnp.allclose(out_big, ref_big, atol=2e-3, rtol=2e-3)
    assert jnp.allclose(jnp.sum(out_big, axis=1), 1.0, atol=1e-4)

    print("KERNEL_OK")
</pallas_src>

<mosaic_0001>
module attributes {stable_mosaic.version = 11 : i64} {
  func.func @_policy_net_kernel(%arg0: memref<8x8xf32, #tpu.memory_space<vmem>>, %arg1: memref<48x128xbf16, #tpu.memory_space<vmem>>, %arg2: memref<32x128xf32, #tpu.memory_space<vmem>>, %arg3: memref<4x8xf32, #tpu.memory_space<vmem>>) attributes {dimension_semantics = [], scalar_prefetch = 0 : i64, scratch_operands = 0 : i64, tpu.core_type = #tpu.core_type<tc>} {
    %c0 = arith.constant 0 : index
    %c0_0 = arith.constant 0 : index
    %0 = vector.load %arg1[%c0, %c0_0] : memref<48x128xbf16, #tpu.memory_space<vmem>>, vector<32x8xbf16>
    %c32 = arith.constant 32 : index
    %c0_1 = arith.constant 0 : index
    %1 = vector.load %arg1[%c32, %c0_1] : memref<48x128xbf16, #tpu.memory_space<vmem>>, vector<4x32xbf16>
    %c0_2 = arith.constant 0 : index
    %c0_3 = arith.constant 0 : index
    %2 = vector.load %arg2[%c0_2, %c0_3] : memref<32x128xf32, #tpu.memory_space<vmem>>, vector<32x1xf32>
    %c0_4 = arith.constant 0 : index
    %c1 = arith.constant 1 : index
    %3 = vector.load %arg2[%c0_4, %c1] : memref<32x128xf32, #tpu.memory_space<vmem>>, vector<4x1xf32>
    %c0_5 = arith.constant 0 : index
    %c0_6 = arith.constant 0 : index
    %4 = vector.load %arg0[%c0_5, %c0_6] : memref<8x8xf32, #tpu.memory_space<vmem>>, vector<8x8xf32>
    %5 = arith.truncf %4 : vector<8x8xf32> to vector<8x8xbf16>
    %cst = arith.constant dense<0.000000e+00> : vector<32x8xf32>
    %6 = tpu.matmul %0, %5, %cst {dimension_numbers = #tpu.dot_dimension_numbers<[1], [0], [0], [1], [0, 0, 1, 1], [], []>} : vector<32x8xbf16>, vector<8x8xbf16>, vector<32x8xf32> -> vector<32x8xf32>
    %7 = vector.broadcast %2 : vector<32x1xf32> to vector<32x8xf32>
    %8 = arith.addf %6, %7 : vector<32x8xf32>
    %cst_7 = arith.constant 0.000000e+00 : f32
    %9 = vector.broadcast %cst_7 : f32 to vector<32x8xf32>
    %10 = arith.maximumf %8, %9 : vector<32x8xf32>
    %11 = arith.truncf %10 : vector<32x8xf32> to vector<32x8xbf16>
    %cst_8 = arith.constant dense<0.000000e+00> : vector<4x8xf32>
    %12 = tpu.matmul %1, %11, %cst_8 {dimension_numbers = #tpu.dot_dimension_numbers<[1], [0], [0], [1], [0, 0, 1, 1], [], []>} : vector<4x32xbf16>, vector<32x8xbf16>, vector<4x8xf32> -> vector<4x8xf32>
    %13 = vector.broadcast %3 : vector<4x1xf32> to vector<4x8xf32>
    %14 = arith.addf %12, %13 : vector<4x8xf32>
    %cst_9 = arith.constant dense<0xFF800000> : vector<8xf32>
    %15 = vector.multi_reduction <maximumf>, %14, %cst_9 [0] : vector<4x8xf32> to vector<8xf32>
    %16 = vector.shape_cast %15 : vector<8xf32> to vector<1x8xf32>
    %17 = vector.broadcast %16 : vector<1x8xf32> to vector<4x8xf32>
    %18 = arith.subf %14, %17 : vector<4x8xf32>
    %19 = math.exp %18 : vector<4x8xf32>
    %cst_10 = arith.constant dense<0.000000e+00> : vector<8xf32>
    %20 = vector.multi_reduction <add>, %19, %cst_10 [0] : vector<4x8xf32> to vector<8xf32>
    %21 = vector.shape_cast %20 : vector<8xf32> to vector<1x8xf32>
    %22 = vector.broadcast %21 : vector<1x8xf32> to vector<4x8xf32>
    %23 = arith.divf %19, %22 : vector<4x8xf32>
    %c0_11 = arith.constant 0 : index
    %c0_12 = arith.constant 0 : index
    %24 = vector.load %arg3[%c0_11, %c0_12] : memref<4x8xf32, #tpu.memory_space<vmem>>, vector<4x8xf32>
    tpu.vector_store %arg3[%c0_11, %c0_12], %23 {strides = array<i32>} : memref<4x8xf32, #tpu.memory_space<vmem>>, vector<4x8xf32>,
    return
  }
}

</mosaic_0001>

<bundles_post_ra>
// kernel: tpu_custom_call.1
= control target key start
LH: loop header
LB: loop body
LE: loop exit
PB: predicated region body
PF: predicated region fallthrough
CT: control target
= control target key end

     0   :  { %8 = vsyncpa [#allocation3], 0  ;;  %s473_s0 = inlined_call_operand.hbm [shape: f32[8,8], index: 0, kind: input, shape index: {}]   ;;  %s474_s1 = inlined_call_operand.hbm [shape: bf16[48,128], index: 1, kind: input, shape index: {}]   ;;  %s475_s2 = inlined_call_operand.hbm [shape: f32[32,128], index: 2, kind: input, shape index: {}]   ;;  %s476_s3 = inlined_call_operand.hbm [shape: f32[4,8], index: 3, kind: output, shape index: {}]  }
   0x1   :  { %9 = vsyncpa [#allocation6], 0 }
   0x2   :  { %10 = vsyncpa [#allocation4], 0  ;;  %s390_s12 = smov [#allocation5]   ;;  %s296_s16 = scalar_lea.hbm %s474_s1, 384 }
   0x3   :  { %s26_s13 = sshll.u32 %s390_s12, 4  ;;  %p297_p0 = scmp.ne.s32.totalorder %s474_s1, %s296_s16  ;;  %s27_s13 = int_to_ptr.vmem [resolvable:$true] %s26_s13 }
   0x4   :  { %p300_p1 = scmp.lt.u32.totalorder %s296_s16, %s474_s1 }
   0x6   :  { %p302_p2 = pnand %p300_p1, %p297_p0 }
   0x8   :  { %305 = shalt.err (!%p302_p2)
}
   0x9   :  { %s306_s21 = scalar_lea.vmem %s27_s13, 384  ;;  %p311_p4 = scmp.lt.s32.totalorder %s27_s13, %s27_s13 }
   0xa   :  { %p307_p3 = scmp.ne.s32.totalorder %s27_s13, %s306_s21  ;;  %p312_p5 = scmp.lt.s32.totalorder %s306_s21, %s306_s21 }
   0xc   :  { %p313_p6 = por %p312_p5, %p311_p4 }
   0xe   :  { %p314_p7 = pnand %p313_p6, %p307_p3 }
  0x10   :  { %317 = shalt.err (!%p314_p7)
}
  0x11   :  { %s391_s22 = smov 64   ;;  %s392_s23 = smov 4  }
  0x12   :  { %32 = dma.hbm_to_vmem [thread:$0]  %s474_s1, 384, %s27_s13, [#allocation6], %s391_s22, %s391_s22, %s392_s23  }
  0x13   :  { %s393_s26 = smov [#allocation2]   ;;  %s394_s28 = smov [#allocation7]  }
  0x14   :  { %s17_s27 = sshll.u32 %s393_s26, 4  ;;  %s38_s29 = sshll.u32 %s394_s28, 4  ;;  %s18_s27 = int_to_ptr.vmem [resolvable:$true] %s17_s27  ;;  %s39_s29 = int_to_ptr.vmem [resolvable:$true] %s38_s29 }
  0x15   :  { %s318_s5 = scalar_lea.hbm %s473_s0, 128 }
  0x16   :  { %p319_p8 = scmp.ne.s32.totalorder %s473_s0, %s318_s5  ;;  %p322_p9 = scmp.lt.u32.totalorder %s318_s5, %s473_s0 }
  0x18   :  { %p324_p10 = pnand %p322_p9, %p319_p8 }
  0x1a   :  { %327 = shalt.err (!%p324_p10)
}
  0x1b   :  { %s328_s1 = scalar_lea.vmem %s18_s27, 128  ;;  %p333_p12 = scmp.lt.s32.totalorder %s18_s27, %s18_s27 }
  0x1c   :  { %p329_p11 = scmp.ne.s32.totalorder %s18_s27, %s328_s1  ;;  %p334_p13 = scmp.lt.s32.totalorder %s328_s1, %s328_s1 }
  0x1e   :  { %p335_p0 = por %p334_p13, %p333_p12 }
  0x20   :  { %p336_p1 = pnand %p335_p0, %p329_p11 }
  0x22   :  { %339 = shalt.err (!%p336_p1)
}
  0x23   :  { %20 = dma.hbm_to_vmem [thread:$0]  %s473_s0, 128, %s18_s27, [#allocation3]  }
  0x24   :  { %s340_s14 = scalar_lea.hbm %s475_s2, 512 }
  0x25   :  { %p341_p2 = scmp.ne.s32.totalorder %s475_s2, %s340_s14  ;;  %p344_p3 = scmp.lt.u32.totalorder %s340_s14, %s475_s2 }
  0x27   :  { %p346_p4 = pnand %p344_p3, %p341_p2 }
  0x29   :  { %349 = shalt.err (!%p346_p4)
}
  0x2a   :  { %s350_s19 = scalar_lea.vmem %s39_s29, 512  ;;  %p355_p6 = scmp.lt.s32.totalorder %s39_s29, %s39_s29 }
  0x2b   :  { %p351_p5 = scmp.ne.s32.totalorder %s39_s29, %s350_s19  ;;  %p356_p7 = scmp.lt.s32.totalorder %s350_s19, %s350_s19 }
  0x2d   :  { %p357_p8 = por %p356_p7, %p355_p6 }
  0x2f   :  { %p358_p9 = pnand %p357_p8, %p351_p5 }
  0x31   :  { %361 = shalt.err (!%p358_p9)
}
  0x32   :  { %s395_s0 = smov 128   ;;  %s396_s20 = smov 8  }
  0x33   :  { %44 = dma.hbm_to_vmem [thread:$0]  %s475_s2, 512, %s39_s29, [#allocation6], %s395_s0, %s395_s0, %s396_s20  }
  0x34   :  { %384 = dma.done.wait [#allocation3], 128  }
  0x35   :  { %385 = vsyncadd [#allocation3], 4294967168 }
  0x36   :  { %386 = dma.done.wait [#allocation6], 896  }
  0x37   :  { %387 = vsyncadd [#allocation6], 4294966400  ;;  %v397_v0 = vmov 0   ;;  %vm104_vm0 = vcmask 1043456   ;;  %v65_v1 = vld [vmem:[#allocation2] sm:$0xff]  ;;  %vm97_vm1 = vcmask 64512  }
  0x38   :  { %287 = vset.pattern.permute.xlu0 %v397_v0  ;;  %288 = vset.pattern.permute.xlu1 %v397_v0  ;;  %v66_v2 = vpack.c.bf16 %v65_v1, %v65_v1  ;;  %v290_v3 = vld [vmem:[#allocation5] sm:$0xff]   ;;  %v60_v4 = vld [vmem:[#allocation7] sm:$0xff]  ;;  %v62_v5 = vld [vmem:[#allocation7 + $0x10] sm:$0xff]  ;;  %v398_v10 = vmov 0.0   ;;  %vm399_vm2 = vmmov 0   ;;  %v400_v12 = vmov 1  }
  0x39   :  { %262 = vmatprep.mubr.msk.bf16.mxu0 %vm97_vm1, %v290_v3  ;;  %v291_v7 = vld [vmem:[#allocation5 + $0x8] sm:$0xff]   ;;  %69 = vperm.xlu0 %287, %v60_v4   ;;  %v61_v8 = vld [vmem:[#allocation7 + $0x8] sm:$0xff]  ;;  %v63_v9 = vld [vmem:[#allocation7 + $0x18] sm:$0xff]  ;;  %vm168_vm3 = vcmask 261120   ;;  %vm212_vm4 = vcmask 60416   ;;  %s401_s2 = smov [#allocation8]  }
  0x3a   :  { %274 = vmatprep.subr.msk.bf16.mxu0 %vm104_vm0, %v66_v2  ;;  %v106_v6 = vsel %vm104_vm0, %v66_v2, 0  ;;  %79 = vperm.xlu1 %288, %v62_v5   ;;  %v64_v11 = vld [vmem:[#allocation7] sm:$0xf]  ;;  %v59_v31 = vld [vmem:[#allocation5 + $0x10] sm:$0x3]  ;;  %s239_s23 = sshll.u32 %s401_s2, 4  ;;  %s240_s23 = int_to_ptr.vmem [resolvable:$true] %s239_s23 }
  0x3b   :  { %261 = vmatpush3.bf16.msra.mxu0 %v106_v6  ;;  %266 = vmatprep.subr.bf16.mxu1 %v398_v10  ;;  %s362_s24 = scalar_lea.vmem %s240_s23, 64  ;;  %p367_p11 = scmp.lt.s32.totalorder %s240_s23, %s240_s23 }
  0x3c   :  { %270 = vmatprep.mubr.msk.bf16.mxu1 %vm399_vm2, %v398_v10  ;;  %p363_p10 = scmp.ne.s32.totalorder %s240_s23, %s362_s24  ;;  %p368_p12 = scmp.lt.s32.totalorder %s362_s24, %s362_s24 }
  0x3d   :  { %74 = vperm.xlu0 %287, %v61_v8  }
  0x3e   :  { %263 = vmatmul.mubr.msk.bf16.vlgmr.msra.gmra.mrb[0].mxu0 %vm97_vm1, %v291_v7  ;;  %84 = vperm.xlu1 %288, %v63_v9   ;;  %p369_p13 = por %p368_p12, %p367_p11 }
  0x40   :  { %p370_p0 = pnand %p369_p13, %p363_p10 }
  0x41   :  { %289 = vset.pattern.permute.xlu0 %v400_v12 }
  0x42   :  { %165 = vperm.xlu0 %289, %v64_v11  }
  0xb8   :  { %v70_v14 = vpop.permute.xlu0 %69 }
  0xb9   :  { %v80_v13 = vpop.permute.xlu1 %79 }
  0xbc   :  { %v75_v21 = vpop.permute.xlu0 %74 }
  0xbd   :  { %v85_v16 = vpop.permute.xlu1 %84 }
  0xc1   :  { %v166_v32 = vpop.permute.xlu0 %165 }
 0x111   :  { %v264_v15 = vpop.f32.mrb[0].mxu0 }
 0x112   :  { %v151_v17 = vadd.f32 %v264_v15, %v80_v13  ;;  %v142_v18 = vpop.f32.mrb[1].mxu0 }
 0x113   :  { %v143_v19 = vadd.f32 %v142_v18, %v70_v14  ;;  %v265_v20 = vpop.f32.mrb[2].mxu0 }
 0x114   :  { %v154_v22 = vadd.f32 %v265_v20, %v85_v16  ;;  %v145_v23 = vpop.f32.mrb[3].mxu0  ;;  %v159_v25 = vmax.f32 %v151_v17, 0.0 }
 0x115   :  { %v146_v24 = vadd.f32 %v145_v23, %v75_v21  ;;  %v157_v27 = vmax.f32 %v143_v19, 0.0 }
 0x116   :  { %v160_v26 = vmax.f32 %v154_v22, 0.0 }
 0x117   :  { %v158_v28 = vmax.f32 %v146_v24, 0.0 }
 0x118   :  { %v162_v29 = vpack.c.bf16 %v160_v26, %v159_v25 }
 0x119   :  { %v161_v30 = vpack.c.bf16 %v158_v28, %v157_v27 }
 0x11b   :  { %267 = vmatpush3.bf16.msra.mxu1 %v161_v30 }
 0x11c   :  { %268 = vmatprep.subr.bf16.mxu1 %v398_v10 }
 0x11f   :  { %269 = vmatpush3.bf16.msra.mxu1 %v162_v29 }
 0x122   :  { %271 = vmatmul.mubr.msk.bf16.vlgmr.msra.gmra.mrb[0].mxu1 %vm168_vm3, %v59_v31 }
 0x1f5   :  { %v206_v33 = vpop.f32.mrb[0].mxu1 }
 0x1f6   :  { %v207_v34 = vadd.f32 %v206_v33, %v166_v32  ;;  %v272_v35 = vpop.f32.mrb[1].mxu1 }
 0x1f7   :  { %v209_v36 = vpop.f32.mrb[2].mxu1 }
 0x1f8   :  { %v213_v37 = vsel %vm212_vm4, %v207_v34, -inf  ;;  %v273_v38 = vpop.f32.mrb[3].mxu1 }
 0x1f9   :  { %v214_v39 = vrot.slane %v213_v37, 4 }
 0x1fb   :  { %v215_v40 = vmax.f32 %v213_v37, %v214_v39 }
 0x1fd   :  { %v216_v41 = vrot.slane %v215_v40, 2 }
 0x1ff   :  { %v217_v42 = vmax.f32 %v215_v40, %v216_v41 }
 0x201   :  { %v218_v43 = vrot.slane %v217_v42, 1 }
 0x203   :  { %v219_v44 = vmax.f32 %v217_v42, %v218_v43 }
 0x205   :  { %v220_v45 = vsub.f32 %v207_v34, %v219_v44 }
 0x207   :  { %v221_v46 = vmul.f32 1.442695, %v220_v45 }
 0x209   :  { %292 = vpow2.f32 %v221_v46 }
 0x213   :  { %v293_v47 = vpop.eup %292 }
 0x214   :  { %v223_v48 = vsel %vm212_vm4, %v293_v47, 0.0 }
 0x215   :  { %v224_v49 = vrot.slane %v223_v48, 4 }
 0x217   :  { %v225_v50 = vadd.f32 %v224_v49, %v223_v48 }
 0x219   :  { %v226_v51 = vrot.slane %v225_v50, 2 }
 0x21b   :  { %v227_v52 = vadd.f32 %v226_v51, %v225_v50 }
 0x21d   :  { %v228_v53 = vrot.slane %v227_v52, 1 }
 0x21f   :  { %v229_v54 = vadd.f32 %v228_v53, %v227_v52 }
 0x221   :  { %294 = vrcp.f32 %v229_v54 }
 0x22b   :  { %v295_v55 = vpop.eup %294 }
 0x22c   :  { %v231_v56 = vmul.f32 %v295_v55, %v293_v47 }
 0x22e   :  { %232 = vst.msk [vmem:[#allocation8] sm:$0xf] %vm212_vm4, %v231_v56 }
 0x22f   :  { %373 = shalt.err (!%p370_p0)
}
 0x230   :  { %s374_s27 = scalar_lea.hbm %s476_s3, 64 }
 0x231   :  { %p375_p1 = scmp.ne.s32.totalorder %s476_s3, %s374_s27  ;;  %p378_p2 = scmp.lt.u32.totalorder %s374_s27, %s476_s3 }
 0x233   :  { %p380_p3 = pnand %p378_p2, %p375_p1 }
 0x235   :  { %383 = shalt.err (!%p380_p3)
}
 0x236   :  { %242 = dma.vmem_to_hbm [thread:$0]  %s240_s23, 64, %s476_s3, [#allocation4]  }
 0x237   :  { %388 = dma.done.wait [#allocation4], 64  }
 0x238   :  { %389 = vsyncadd [#allocation4], 4294967232 }
 0x239   :  { %246 = vsyncpa [#allocation3], 1 }
 0x23a   :  { %247 = vsyncpa [#allocation6], 1 }
 0x23b   :  { %248 = vsyncpa [#allocation4], 1 }

</bundles_post_ra>
